<compile_context>
chip_gen: v7x
topology: tpu7x:2x2x1
jax: 0.10.0
libtpu: 0.0.40
codegen_flags: <defaults>
</compile_context>

<pallas_src>
import jax
import jax.numpy as jnp
from jax.experimental import pallas as pl
from jax.experimental.pallas import tpu as pltpu


def _bbox_head_kernel(w_ref, b_ref, x_ref, o_ref):
    # w_ref: (C_out, C)   resident weights (constant index_map)
    # b_ref: (C_out, 1)   resident f32 bias, added on the f32 accumulator
    # x_ref: (C, t)       streamed pixel tile, pixels along lanes, native dtype
    # o_ref: (C_out, t)   lane-dense output tile
    acc = jnp.dot(w_ref[...], x_ref[...], preferred_element_type=jnp.float32)
    o_ref[...] = (acc + b_ref[...]).astype(o_ref.dtype)


def _round_up(v, m):
    return ((v + m - 1) // m) * m


def bbox_head_pallas(x_nchw, weight, bias, *, num_anchors=3, t_hw=None,
                     vmem_budget_bytes=24 * 1024 * 1024):
    """x_nchw: (N, C, H, W); weight: (C_out, C_in, 1, 1); bias: (C_out,)."""
    N, C, H, W = x_nchw.shape
    C_out = weight.shape[0]
    assert C_out == num_anchors * 4
    out_dtype = x_nchw.dtype
    HW = H * W
    hw128 = _round_up(HW, 128)

    # Pixel-tile size: biggest lane-dense tile whose double-buffered f32
    # in+out working set fits the VMEM budget; capped at 8192 (DMA is at
    # roofline long before that) and at the 128-rounded feature-map size.
    bytes_per_col = 2 * (C + C_out) * 4          # double-buffered f32 in + out
    t = (vmem_budget_bytes // bytes_per_col) // 128 * 128
    t = max(128, min(t, 8192, hw128))
    if t_hw is not None:
        t = max(128, min(t, _round_up(t_hw, 128)))
    # v7x megacore: with a single batch item keep >= 2 pixel tiles so both
    # TensorCores get a share of the ("parallel", "parallel") grid.
    if N == 1 and hw128 > 128:
        t = min(t, max(128, _round_up(pl.cdiv(HW, 2), 128)))

    n_hw = pl.cdiv(HW, t)   # ragged last block handled by Pallas; no pad pass

    # Free reshape only: NCHW -> (N, C, HW).  No cast, no pad, no transpose.
    x3 = x_nchw.reshape(N, C, HW)
    w_mat = weight.reshape(C_out, C).astype(x3.dtype)      # (C_out, C)
    b_mat = bias.reshape(C_out, 1).astype(jnp.float32)     # f32 bias

    cost = pl.CostEstimate(
        flops=2 * N * HW * C * C_out,
        transcendentals=0,
        bytes_accessed=int(
            x3.size * x3.dtype.itemsize
            + w_mat.size * w_mat.dtype.itemsize
            + b_mat.size * b_mat.dtype.itemsize
            + N * C_out * HW * jnp.dtype(out_dtype).itemsize),
    )

    out_chw = pl.pallas_call(
        _bbox_head_kernel,
        out_shape=jax.ShapeDtypeStruct((N, C_out, HW), out_dtype),
        grid_spec=pltpu.PrefetchScalarGridSpec(
            num_scalar_prefetch=0,
            grid=(N, n_hw),
            in_specs=[
                pl.BlockSpec((C_out, C), lambda n, j: (0, 0)),       # weights
                pl.BlockSpec((C_out, 1), lambda n, j: (0, 0)),       # bias
                pl.BlockSpec((None, C, t), lambda n, j: (n, 0, j)),  # x tile
            ],
            out_specs=pl.BlockSpec((None, C_out, t), lambda n, j: (n, 0, j)),
        ),
        compiler_params=pltpu.CompilerParams(
            dimension_semantics=("parallel", "parallel"),
            vmem_limit_bytes=32 * 1024 * 1024,
        ),
        cost_estimate=cost,
    )(w_mat, b_mat, x3)

    # Cheap glue on the tiny (C_out = 12)-channel output:
    # (N, C_out, HW) -> (N, HW, C_out) -> (N, HW*num_anchors, 4).
    # TODO(synk): downstream box decode could consume the (N, C_out, HW)
    # layout directly and delete this extra HBM pass entirely.
    out = jnp.transpose(out_chw, (0, 2, 1)).reshape(N, HW * num_anchors, 4)
    return out


if __name__ == "__main__":
    num_anchors = 3
    C_out = num_anchors * 4

    key = jax.random.PRNGKey(0)
    k1, k2, k3, k4 = jax.random.split(key, 4)

    def reference(x, w4, b):
        n, c, h, w = x.shape
        co = w4.shape[0]
        r = jnp.einsum("nchw,oc->nhwo", x, w4.reshape(co, c),
                       precision=jax.lax.Precision.HIGHEST) + b
        return r.reshape(n, h * w * num_anchors, 4)

    def bf16_reference(x, w4, b):
        return reference(x.astype(jnp.bfloat16).astype(jnp.float32),
                         w4.astype(jnp.bfloat16).astype(jnp.float32), b)

    # --- Primary check: batch=2, 32 in-channels, 16x16 feature map. ---------
    N, C_in, H, W = 2, 32, 16, 16
    x = jax.random.normal(k1, (N, C_in, H, W), dtype=jnp.float32)
    weight = jax.random.normal(k2, (C_out, C_in, 1, 1), dtype=jnp.float32) * 0.05
    bias = jax.random.normal(k3, (C_out,), dtype=jnp.float32) * 0.01

    out = jax.block_until_ready(
        bbox_head_pallas(x, weight, bias, num_anchors=num_anchors))

    ref = reference(x, weight, bias)
    # Tolerance: a few x the bf16-rounding envelope (covers whichever MXU
    # precision the f32 dot lowers to), plus a tiny absolute floor.
    tol = 4.0 * float(jnp.max(jnp.abs(ref - bf16_reference(x, weight, bias)))) + 1e-5
    assert out.shape == (N, H * W * num_anchors, 4), out.shape
    err = float(jnp.max(jnp.abs(out - ref)))
    assert err <= tol, (err, tol)

    # --- Second check: ragged HW (not a multiple of the pixel tile) and the
    #     N == 1 two-tile megacore split, with no pad / no slice pass. -------
    N2, C2, H2, W2 = 1, 48, 20, 20
    x2 = jax.random.normal(k4, (N2, C2, H2, W2), dtype=jnp.float32)
    w2 = jax.random.normal(k2, (C_out, C2, 1, 1), dtype=jnp.float32) * 0.05
    b2 = jax.random.normal(k3, (C_out,), dtype=jnp.float32) * 0.01

    out2 = jax.block_until_ready(
        bbox_head_pallas(x2, w2, b2, num_anchors=num_anchors))

    ref2 = reference(x2, w2, b2)
    tol2 = 4.0 * float(jnp.max(jnp.abs(ref2 - bf16_reference(x2, w2, b2)))) + 1e-5
    assert out2.shape == (N2, H2 * W2 * num_anchors, 4), out2.shape
    err2 = float(jnp.max(jnp.abs(out2 - ref2)))
    assert err2 <= tol2, (err2, tol2)

    print("KERNEL_OK")
</pallas_src>

<mosaic_0001>
module attributes {stable_mosaic.version = 11 : i64} {
  func.func @_bbox_head_kernel(%arg0: i32, %arg1: i32, %arg2: memref<12x32xf32, #tpu.memory_space<vmem>>, %arg3: memref<12x1xf32, #tpu.memory_space<vmem>>, %arg4: memref<1x32x256xf32, #tpu.memory_space<vmem>>, %arg5: memref<1x12x256xf32, #tpu.memory_space<vmem>>) attributes {dimension_semantics = [#tpu.dimension_semantics<parallel>, #tpu.dimension_semantics<parallel>], iteration_bounds = array<i64: 2, 1>, scalar_prefetch = 0 : i64, scratch_operands = 0 : i64, tpu.core_type = #tpu.core_type<tc>, window_params = [{pipeline_mode = #tpu.pipeline_mode<synchronous>, transform_indices = @transform_0, window_bounds = array<i64: 12, 32>}, {pipeline_mode = #tpu.pipeline_mode<synchronous>, transform_indices = @transform_1, window_bounds = array<i64: 12, 1>}, {transform_indices = @transform_2, window_bounds = array<i64: 1, 32, 256>}, {transform_indices = @transform_3, window_bounds = array<i64: 1, 12, 256>}]} {
    %c0 = arith.constant 0 : index
    %c0_0 = arith.constant 0 : index
    %0 = vector.load %arg2[%c0, %c0_0] : memref<12x32xf32, #tpu.memory_space<vmem>>, vector<12x32xf32>
    %c0_1 = arith.constant 0 : index
    %c0_2 = arith.constant 0 : index
    %c0_3 = arith.constant 0 : index
    %1 = vector.load %arg4[%c0_1, %c0_2, %c0_3] : memref<1x32x256xf32, #tpu.memory_space<vmem>>, vector<1x32x256xf32>
    %2 = vector.shape_cast %1 : vector<1x32x256xf32> to vector<32x256xf32>
    %cst = arith.constant dense<0.000000e+00> : vector<12x256xf32>
    %3 = tpu.matmul %0, %2, %cst {dimension_numbers = #tpu.dot_dimension_numbers<[1], [0], [0], [1], [0, 0, 1, 1], [], []>} : vector<12x32xf32>, vector<32x256xf32>, vector<12x256xf32> -> vector<12x256xf32>
    %c0_4 = arith.constant 0 : index
    %c0_5 = arith.constant 0 : index
    %4 = vector.load %arg3[%c0_4, %c0_5] : memref<12x1xf32, #tpu.memory_space<vmem>>, vector<12x1xf32>
    %5 = vector.broadcast %4 : vector<12x1xf32> to vector<12x256xf32>
    %6 = arith.addf %3, %5 : vector<12x256xf32>
    %c0_6 = arith.constant 0 : index
    %c0_7 = arith.constant 0 : index
    %c0_8 = arith.constant 0 : index
    %7 = vector.load %arg5[%c0_6, %c0_7, %c0_8] : memref<1x12x256xf32, #tpu.memory_space<vmem>>, vector<1x12x256xf32>
    %8 = vector.shape_cast %7 : vector<1x12x256xf32> to vector<12x256xf32>
    %9 = vector.shape_cast %6 : vector<12x256xf32> to vector<1x12x256xf32>
    tpu.vector_store %arg5[%c0_6, %c0_7, %c0_8], %9 {strides = array<i32>} : memref<1x12x256xf32, #tpu.memory_space<vmem>>, vector<1x12x256xf32>,
    return
  }
  func.func @transform_0(%arg0: i32, %arg1: i32) -> (i32, i32) {
    %c0_i32 = arith.constant 0 : i32
    %c0_i32_0 = arith.constant 0 : i32
    %c0_i32_1 = arith.constant 0 : i32
    return %c0_i32, %c0_i32_0 : i32, i32
  }
  func.func @transform_1(%arg0: i32, %arg1: i32) -> (i32, i32) {
    %c0_i32 = arith.constant 0 : i32
    %c0_i32_0 = arith.constant 0 : i32
    %c0_i32_1 = arith.constant 0 : i32
    return %c0_i32, %c0_i32_0 : i32, i32
  }
  func.func @transform_2(%arg0: i32, %arg1: i32) -> (i32, i32, i32) {
    %c0_i32 = arith.constant 0 : i32
    %c0_i32_0 = arith.constant 0 : i32
    return %arg0, %c0_i32, %arg1 : i32, i32, i32
  }
  func.func @transform_3(%arg0: i32, %arg1: i32) -> (i32, i32, i32) {
    %c0_i32 = arith.constant 0 : i32
    %c0_i32_0 = arith.constant 0 : i32
    return %arg0, %c0_i32, %arg1 : i32, i32, i32
  }
}

</mosaic_0001>

<bundles_post_ra>
// kernel: tpu_custom_call.1
= control target key start
LH: loop header
LB: loop body
LE: loop exit
PB: predicated region body
PF: predicated region fallthrough
CT: control target
= control target key end

     0   :  { %8 = vsyncpa [#allocation3], 0  ;;  %s756_s0 = inlined_call_operand.vmem [shape: f32[12,32], index: 0, kind: input, shape index: {}]   ;;  %s757_s1 = inlined_call_operand.vmem [shape: f32[12,1], index: 1, kind: input, shape index: {}]   ;;  %s758_s2 = inlined_call_operand.hbm [shape: f32[2,32,256], index: 2, kind: input, shape index: {}]   ;;  %s759_s3 = inlined_call_operand.vmem [shape: f32[2,12,256], index: 3, kind: output, shape index: {}]  }
   0x1   :  { %10 = vsyncpa [#allocation3 + $0x1], 0  ;;  %s620_s12 = smov 0   ;;  %s622_s13 = smov 0  }
   0x2   :  { %s624_s14 = smov 0   ;;  %s626_s15 = smov 0  }
   0x3   :  { %s628_s16 = smov 0   ;;  %s630_s17 = smov 0  }
   0x4 LB: > { %s424_s18 = sadd.s32 4294967295, %s593_s17   ;;  %s28_s19 = sadd.s32 1, %s589_s16  ;;  %s593_s17 = sphi %s630_s17, %s16_s17   ;;  %s589_s16 = sphi %s628_s16, %s767_s16   ;;  %s585_s15 = sphi %s626_s15, %s766_s15   ;;  %s581_s14 = sphi %s624_s14, %s765_s14   ;;  %s577_s13 = sphi %s622_s13, %s764_s13   ;;  %s573_s12 = sphi %s620_s12, %s763_s12  }
   0x5   : > { %p30_p0 = scmp.ge.s32.totalorder %s28_s19, 2  ;;  %s79_s20 = sadd.s32 1, %s581_s14 }
   0x6   : > { %p86_p1 = scmp.ne.s32.totalorder %s581_s14, %s577_s13  ;;  %p87_p2 = scmp.eq.s32.totalorder %s593_s17, 0 }
   0x7   : > { %s769_s19 = smov (%p30_p0, %s28_s19), 0  ;;  %p92_p4 = scmp.ne.s32.totalorder %s577_s13, %s573_s12 }
   0x8   : > { %p656_p3 = por %p87_p2, %p86_p1  ;;  %s74_s22 = ssub.s32 %s589_s16, %s769_s19 }
   0x9   : > { %p93_p5 = scmp.eq.s32.totalorder %s424_s18, 0  ;;  %p77_p6 = scmp.eq.s32.totalorder %s74_s22, 0 }
   0xa   : > { %p459_p8 = scmp.lt.s32.totalorder %s593_s17, 2  ;;  %s150_s25 = sand.u32 1, %s581_s14  }
   0xb   : > { %p663_p7 = por %p93_p5, %p92_p4  ;;  %s439_s26 = sshll.u32 %s589_s16, 10 }
   0xc   : > { %s669_s24 = scalar_select %p77_p6, %s581_s14, %s79_s20  }
   0xd   : > { %s428_s27 = sshll.u32 %s150_s25, 6  ;;  %s676_s30 = scalar_lea.hbm %s758_s2, %s439_s26 }
   0xe   : > { %s154_s4 = scalar_lea.vmem [#allocation2], %s428_s27  ;;  %p680_p9 = pnand %p459_p8, %p656_p3 }
   0xf   : > { %s163_s5 = sshll.u32 %s154_s4, 4  ;;  %s686_s7 = scalar_lea.sflag [#allocation3], %s150_s25  ;;  %s684_s5 = int_to_ptr.vmem [resolvable:$true] %s163_s5 }
  0x10   : > { %s513_s8 = scalar_lea.hbm %s676_s30, 1024  ;;  %p515_p11 = pneg %p680_p9 }
  0x11   : > { %p514_p10 = scmp.ne.s32.totalorder %s676_s30, %s513_s8  ;;  %s518_s11 = scalar_lea.hbm %s758_s2, 2048 }
  0x12   : > { %p519_p0 = scmp.lt.u32.totalorder %s676_s30, %s758_s2  ;;  %p520_p1 = scmp.lt.u32.totalorder %s518_s11, %s513_s8 }
  0x13   : > { %p516_p12 = pnand %p515_p11, %p514_p10  ;;  %p522_p3 = scmp.lt.u32.totalorder %s513_s8, %s676_s30 }
  0x14   : > { %p521_p2 = por %p520_p1, %p519_p0 }
  0x15   : > { %p517_p13 = pneg %p516_p12 }
  0x16   : > { %p523_p4 = por %p522_p3, %p521_p2 }
  0x18   : > { %p524_p5 = pnand %p523_p4, %p517_p13 }
  0x1a   : > { %527 = shalt.err (!%p524_p5)
}
  0x1b   : > { %s528_s20 = scalar_lea.vmem %s684_s5, 1024  ;;  %s595_s21 = smov [#allocation2]  }
  0x1c   : > { %p529_p6 = scmp.ne.s32.totalorder %s684_s5, %s528_s20  ;;  %s533_s22 = sshll.u32 %s595_s21, 4  ;;  %s534_s22 = int_to_ptr.vmem [resolvable:$false] %s533_s22 }
  0x1d   : > { %s535_s25 = scalar_lea.vmem %s534_s22, 2048  ;;  %p536_p12 = scmp.lt.s32.totalorder %s684_s5, %s534_s22 }
  0x1e   : > { %p531_p8 = pnand %p529_p6, %p515_p11  ;;  %p537_p0 = scmp.lt.s32.totalorder %s535_s25, %s528_s20 }
  0x20   : > { %p532_p10 = pneg %p531_p8  ;;  %p538_p1 = por %p537_p0, %p536_p12 }
  0x22   : > { %p539_p2 = pnand %p538_p1, %p532_p10 }
  0x24   : > { %542 = shalt.err (!%p539_p2)
}
  0x25   : > { %s596_s26 = smov 256   ;;  %s597_s27 = smov 16  }
  0x26   : > { %458 = dma.hbm_to_vmem [thread:$0]  (!%p680_p9), %s676_s30, 1024, %s684_s5, %s686_s7, %s596_s26, %s596_s26, %s597_s27  }
  0x27   : > { %p431_p11 = scmp.ge.s32.totalorder %s593_s17, 1  ;;  %p171_p13 = scmp.lt.s32.totalorder %s593_s17, 3 }
  0x29   : > { %p172_p3 = pnand %p431_p11, %p171_p13 }
  0x2a   : > { %s177_s28 = sand.u32 (!%p172_p3), 1, %s577_s13  }
  0x2b   : > { %175 = sbr.rel (%p172_p3) target bundleno = 278 (0x116), region = 32  ;;  %s432_s29 = sshll.u32 (!%p172_p3), %s177_s28, 6 }
  0x2c   : > { %s178_s4 = scalar_lea.sflag (!%p172_p3), [#allocation3], %s177_s28  ;;  %s181_s8 = scalar_lea.vmem (!%p172_p3), [#allocation2], %s432_s29 }
  0x32   : > { %568 = dma.done.wait (%p663_p7), %s178_s4, 1024  }
  0x33   : > { %570 = vsyncadd (%p663_p7), %s178_s4, 4294966272  ;;  %v598_v0 = vmov 0.0   ;;  %v599_v1 = vmov 0   ;;  %v222_v2 = vld [vmem:[%s181_s8 + $0x8] sm:$0xff]  ;;  %v224_v3 = vld [vmem:[%s181_s8 + $0x18] sm:$0xff]  ;;  %vm241_vm0 = vcmask 261120  }
  0x34   : > { %312 = vmatprep.mubr.f32.mxu0 %v598_v0  ;;  %318 = vmatprep.mubr.f32.mxu1 %v598_v0  ;;  %v221_v4 = vld [vmem:[%s181_s8] sm:$0xff]  ;;  %v441_v5 = vpack.c.bf16 %v224_v3, %v222_v2  ;;  %v223_v6 = vld [vmem:[%s181_s8 + $0x10] sm:$0xff]  ;;  %v226_v7 = vld [vmem:[%s181_s8 + $0x28] sm:$0xff]  ;;  %p210_p7 = scmp.lt.s32.totalorder %s585_s15, 1 }
  0x35   : > { %512 = vset.pattern.permute.xlu0 %v599_v1  ;;  %v228_v8 = vld [vmem:[%s181_s8 + $0x38] sm:$0xff]  ;;  %v443_v9 = vpack.c.bf16 %v223_v6, %v221_v4  ;;  %v225_v11 = vld [vmem:[%s181_s8 + $0x20] sm:$0xff]  ;;  %v227_v12 = vld [vmem:[%s181_s8 + $0x30] sm:$0xff] }
  0x36   : > { %v445_v10 = vpack.c.bf16 %v228_v8, %v226_v7  ;;  %442 = vmatprep.subr.bf16.mxu0 %v441_v5  ;;  %449 = vmatprep.subr.bf16.mxu1 %v441_v5  ;;  %v229_v13 = vld [vmem:[%s757_s1] sm:$0xff]  ;;  %v447_v14 = vpack.c.bf16 %v227_v12, %v225_v11  ;;  %v230_v15 = vld [vmem:[%s757_s1 + $0x8] sm:$0xf]  ;;  %s771_s15 = smov (!%p210_p7, %s585_s15), 1 }
  0x37   : > { %444 = vmatpush1.bf16.msra.mxu0 %v443_v9  ;;  %451 = vmatpush1.bf16.msra.mxu1 %v443_v9  ;;  %v219_v16 = vld [vmem:[%s756_s0] sm:$0xff]  ;;  %v220_v17 = vld [vmem:[%s756_s0 + $0x8] sm:$0xf]  ;;  %s440_s12 = sshll.u32 %s771_s15, 5 }
  0x38   : > { %446 = vmatprep.subr.bf16.mxu0 %v445_v10  ;;  %450 = vmatprep.subr.bf16.mxu1 %v445_v10  ;;  %s217_s21 = scalar_lea.vmem %s759_s3, %s440_s12 }
  0x39   : > { %233 = vperm.xlu0 %512, %v229_v13  }
  0x3b   : > { %448 = vmatpush1.bf16.msra.mxu0 %v447_v14  ;;  %452 = vmatpush1.bf16.msra.mxu1 %v447_v14 }
  0x3d   : > { %238 = vperm.xlu0 %512, %v230_v15  }
  0x3e   : > { %435 = vmatmul.mubr.msk.f32.vlgmr.msra.gmra.mrb[0].mxu0 %vm241_vm0, %v219_v16  ;;  %436 = vmatmul.mubr.msk.f32.vlgmr.msra.gmra.mrb[0].mxu1 %vm241_vm0, %v220_v17 }
  0xb8   : > { %v234_v18 = vpop.permute.xlu0 %233 }
  0xbc   : > { %v239_v19 = vpop.permute.xlu0 %238 }
 0x111   : > { %v314_v20 = vpop.f32.mrb[0].mxu0  ;;  %v320_v21 = vpop.f32.mrb[0].mxu1 }
 0x112   : > { %v315_v22 = vadd.f32 %v314_v20, %v234_v18  ;;  %v321_v23 = vadd.f32 %v320_v21, %v239_v19  ;;  %v316_v24 = vpop.f32.mrb[1].mxu0  ;;  %v322_v25 = vpop.f32.mrb[1].mxu1 }
 0x113   : > { %v317_v26 = vadd.f32 %v316_v24, %v234_v18  ;;  %v323_v27 = vadd.f32 %v322_v25, %v239_v19 }
 0x114   : > { %325 = vst [vmem:[%s217_s21] sm:$0xff] %v315_v22  ;;  %327 = vst [vmem:[%s217_s21 + $0x10] sm:$0xf] %v321_v23 }
 0x115   : > { %326 = vst [vmem:[%s217_s21 + $0x8] sm:$0xff] %v317_v26  ;;  %328 = vst [vmem:[%s217_s21 + $0x18] sm:$0xf] %v323_v27 }
 0x116 PF: > { %s16_s17 = sadd.s32 1, %s593_s17   ;;  %s763_s12 = smov %s577_s13 }
 0x117   : > { %p13_p9 = scmp.ge.s32.totalorder %s16_s17, 4   ;;  %s764_s13 = smov %s581_s14 }
 0x118   : > { %s765_s14 = smov %s669_s24  ;;  %s766_s15 = smov %s589_s16 }
 0x119   : > { %s767_s16 = smov %s769_s19  ;;  %15 = sbr.rel (!%p13_p9) target bundleno = 4 (0x4), region = 72 }
 0x120   :  { %359 = vsyncpa [#allocation3], 1 }
 0x121   :  { %361 = vsyncpa [#allocation3 + $0x1], 1 }

</bundles_post_ra>
